<compile_context>
chip_gen: v6e
topology: v6e:2x2x1
jax: 0.10.0
libtpu: 0.0.40
codegen_flags: <defaults>
</compile_context>

<pallas_src>
import jax
import jax.numpy as jnp
from jax.experimental import pallas as pl
from jax.experimental.pallas import tpu as pltpu


def mlp_kernel(x_ref, w1_ref, b1_ref, w2_ref, b2_ref, w3p_ref, b3p_ref, o_ref):
    # fc1 + ReLU   (MXU: bf16 x bf16 -> f32 accumulate; elementwise in f32)
    x_bf = x_ref[...].astype(jnp.bfloat16)            # in-kernel cast (VPU, rides in slack)
    h1 = jnp.dot(x_bf, w1_ref[...], preferred_element_type=jnp.float32)
    h1 = jnp.maximum(h1 + b1_ref[...], 0.0)
    # fc2 + ReLU
    h2 = jnp.dot(h1.astype(jnp.bfloat16), w2_ref[...],
                 preferred_element_type=jnp.float32)
    h2 = jnp.maximum(h2 + b2_ref[...], 0.0)
    # fc3 (lane-padded to 128 columns for a clean MXU shape) + sigmoid.
    z = jnp.dot(h2.astype(jnp.bfloat16), w3p_ref[...],
                preferred_element_type=jnp.float32) + b3p_ref[...]
    # Only column 0 is real; store the compact (tb, 1) slice -> 4 B/row write-back.
    o_ref[...] = jax.nn.sigmoid(z[:, :1]).astype(o_ref.dtype)


def pack_params(params, *, op=128):
    """One-time parameter packing (bf16 MXU weights, lane-padded fc3). Call once,
    outside the per-step/per-call path."""
    H2, O = params["w3"].shape
    w3p = jnp.zeros((H2, op), jnp.float32).at[:, :O].set(params["w3"])
    b3p = jnp.zeros((1, op), jnp.float32).at[:, :O].set(params["b3"])
    return {
        "w1": params["w1"].astype(jnp.bfloat16),
        "b1": params["b1"],                       # biases stay f32 (VPU add in f32)
        "w2": params["w2"].astype(jnp.bfloat16),
        "b2": params["b2"],
        "w3p": w3p.astype(jnp.bfloat16),
        "b3p": b3p,
        "out_features": O,
    }


def mlp_forward(x, packed, *, tb=1024):
    """x: (B, F) float32.  packed: output of pack_params().

    tb: rows per grid step (multiple of 128).  Large tb (1024-8192) amortizes the
    ~0.35 us per-grid-step overhead; pick tb so nb = cdiv(B, tb) >= 2 (keeps both
    v7x TensorCores busy).  VMEM footprint stays single-digit MB even at tb=8192.
    """
    B, F = x.shape
    H1 = packed["w1"].shape[1]
    H2 = packed["w2"].shape[1]
    OP = packed["w3p"].shape[1]
    O = packed["out_features"]

    # Pad batch up to a multiple of tb; padded rows are sliced off afterwards.
    nb = pl.cdiv(B, tb)
    Bp = nb * tb
    if Bp != B:
        x = jnp.pad(x, ((0, Bp - B), (0, 0)))

    full = lambda i: (0, 0)            # weights/biases resident across the grid

    out = pl.pallas_call(
        mlp_kernel,
        out_shape=jax.ShapeDtypeStruct((Bp, 1), jnp.float32),
        grid_spec=pltpu.PrefetchScalarGridSpec(
            num_scalar_prefetch=0,
            grid=(nb,),
            in_specs=[
                pl.BlockSpec((tb, F), lambda i: (i, 0)),   # x tile over batch (f32)
                pl.BlockSpec((F, H1), full),               # w1 (bf16)
                pl.BlockSpec((1, H1), full),               # b1 (f32)
                pl.BlockSpec((H1, H2), full),              # w2 (bf16)
                pl.BlockSpec((1, H2), full),               # b2 (f32)
                pl.BlockSpec((H2, OP), full),              # w3 lane-padded (bf16)
                pl.BlockSpec((1, OP), full),               # b3 lane-padded (f32)
            ],
            out_specs=pl.BlockSpec((tb, 1), lambda i: (i, 0)),   # compact write-back
        ),
        compiler_params=pltpu.CompilerParams(
            # On v7x, pltpu.CORE_PARALLEL on this axis would explicitly split the
            # grid across the 2 TensorCores; "parallel" is kept for portability.
            dimension_semantics=("parallel",),
        ),
    )(x, packed["w1"], packed["b1"], packed["w2"], packed["b2"],
      packed["w3p"], packed["b3p"])

    return out[:B, :O]


def init_params(key, input_size, h1=64, h2=32, out=1):
    """Deterministic synthetic init mirroring nn.Linear shapes (weights transposed)."""
    ks = jax.random.split(key, 6)

    def lin(kw, kb, fan_in, fan_out):
        bound = 1.0 / jnp.sqrt(fan_in)
        w = jax.random.uniform(kw, (fan_in, fan_out), jnp.float32, -bound, bound)
        b = jax.random.uniform(kb, (1, fan_out), jnp.float32, -bound, bound)
        return w, b

    w1, b1 = lin(ks[0], ks[1], input_size, h1)
    w2, b2 = lin(ks[2], ks[3], h1, h2)
    w3, b3 = lin(ks[4], ks[5], h2, out)
    return {"w1": w1, "b1": b1, "w2": w2, "b2": b2, "w3": w3, "b3": b3}


def reference(x, params):
    """Pure-JAX reference using the same bf16-input / f32-accumulate dots."""
    h1 = jnp.dot(x.astype(jnp.bfloat16), params["w1"].astype(jnp.bfloat16),
                 preferred_element_type=jnp.float32) + params["b1"]
    h1 = jnp.maximum(h1, 0.0)
    h2 = jnp.dot(h1.astype(jnp.bfloat16), params["w2"].astype(jnp.bfloat16),
                 preferred_element_type=jnp.float32) + params["b2"]
    h2 = jnp.maximum(h2, 0.0)
    z = jnp.dot(h2.astype(jnp.bfloat16), params["w3"].astype(jnp.bfloat16),
                preferred_element_type=jnp.float32) + params["b3"]
    return jax.nn.sigmoid(z)


if __name__ == "__main__":
    key = jax.random.PRNGKey(0)
    k_x, k_p = jax.random.split(key)

    batch = 200          # deliberately NOT a multiple of the tile (exercises padding)
    input_size = 16      # stands in for X_train.shape[1]

    x = jax.random.normal(k_x, (batch, input_size), dtype=jnp.float32)
    params = init_params(k_p, input_size)
    packed = pack_params(params)       # one-time packing, outside the call path

    # tb=128 -> grid of 2 steps even at this small demo batch; use tb=1024+ for real B.
    out = mlp_forward(x, packed, tb=128)
    out = jax.block_until_ready(out)

    ref = reference(x, params)
    assert out.shape == (batch, 1), out.shape
    # bf16 MXU inputs in both paths; exact sigmoid in both -> tight agreement.
    assert jnp.allclose(out, ref, atol=2e-3), (
        "mismatch vs reference: max abs err = "
        f"{float(jnp.max(jnp.abs(out - ref)))}")

    print("KERNEL_OK")
</pallas_src>

<mosaic_0001>
module attributes {stable_mosaic.version = 11 : i64} {
  func.func @mlp_kernel(%arg0: i32, %arg1: memref<128x16xf32, #tpu.memory_space<vmem>>, %arg2: memref<16x64xbf16, #tpu.memory_space<vmem>>, %arg3: memref<1x64xf32, #tpu.memory_space<vmem>>, %arg4: memref<64x32xbf16, #tpu.memory_space<vmem>>, %arg5: memref<1x32xf32, #tpu.memory_space<vmem>>, %arg6: memref<32x128xbf16, #tpu.memory_space<vmem>>, %arg7: memref<1x128xf32, #tpu.memory_space<vmem>>, %arg8: memref<128x1xf32, #tpu.memory_space<vmem>>) attributes {dimension_semantics = [#tpu.dimension_semantics<parallel>], iteration_bounds = array<i64: 2>, scalar_prefetch = 0 : i64, scratch_operands = 0 : i64, tpu.core_type = #tpu.core_type<tc>, window_params = [{transform_indices = @transform_0, window_bounds = array<i64: 128, 16>}, {pipeline_mode = #tpu.pipeline_mode<synchronous>, transform_indices = @transform_1, window_bounds = array<i64: 16, 64>}, {pipeline_mode = #tpu.pipeline_mode<synchronous>, transform_indices = @transform_2, window_bounds = array<i64: 1, 64>}, {pipeline_mode = #tpu.pipeline_mode<synchronous>, transform_indices = @transform_3, window_bounds = array<i64: 64, 32>}, {pipeline_mode = #tpu.pipeline_mode<synchronous>, transform_indices = @transform_4, window_bounds = array<i64: 1, 32>}, {pipeline_mode = #tpu.pipeline_mode<synchronous>, transform_indices = @transform_5, window_bounds = array<i64: 32, 128>}, {pipeline_mode = #tpu.pipeline_mode<synchronous>, transform_indices = @transform_6, window_bounds = array<i64: 1, 128>}, {transform_indices = @transform_7, window_bounds = array<i64: 128, 1>}]} {
    %c0 = arith.constant 0 : index
    %c0_0 = arith.constant 0 : index
    %0 = vector.load %arg1[%c0, %c0_0] : memref<128x16xf32, #tpu.memory_space<vmem>>, vector<128x16xf32>
    %1 = arith.truncf %0 : vector<128x16xf32> to vector<128x16xbf16>
    %c0_1 = arith.constant 0 : index
    %c0_2 = arith.constant 0 : index
    %2 = vector.load %arg2[%c0_1, %c0_2] : memref<16x64xbf16, #tpu.memory_space<vmem>>, vector<16x64xbf16>
    %cst = arith.constant dense<0.000000e+00> : vector<128x64xf32>
    %3 = tpu.matmul %1, %2, %cst {dimension_numbers = #tpu.dot_dimension_numbers<[1], [0], [0], [1], [0, 0, 1, 1], [], []>} : vector<128x16xbf16>, vector<16x64xbf16>, vector<128x64xf32> -> vector<128x64xf32>
    %c0_3 = arith.constant 0 : index
    %c0_4 = arith.constant 0 : index
    %4 = vector.load %arg3[%c0_3, %c0_4] : memref<1x64xf32, #tpu.memory_space<vmem>>, vector<1x64xf32>
    %5 = vector.broadcast %4 : vector<1x64xf32> to vector<128x64xf32>
    %6 = arith.addf %3, %5 : vector<128x64xf32>
    %cst_5 = arith.constant 0.000000e+00 : f32
    %7 = vector.broadcast %cst_5 : f32 to vector<128x64xf32>
    %8 = arith.maximumf %6, %7 : vector<128x64xf32>
    %9 = arith.truncf %8 : vector<128x64xf32> to vector<128x64xbf16>
    %c0_6 = arith.constant 0 : index
    %c0_7 = arith.constant 0 : index
    %10 = vector.load %arg4[%c0_6, %c0_7] : memref<64x32xbf16, #tpu.memory_space<vmem>>, vector<64x32xbf16>
    %cst_8 = arith.constant dense<0.000000e+00> : vector<128x32xf32>
    %11 = tpu.matmul %9, %10, %cst_8 {dimension_numbers = #tpu.dot_dimension_numbers<[1], [0], [0], [1], [0, 0, 1, 1], [], []>} : vector<128x64xbf16>, vector<64x32xbf16>, vector<128x32xf32> -> vector<128x32xf32>
    %c0_9 = arith.constant 0 : index
    %c0_10 = arith.constant 0 : index
    %12 = vector.load %arg5[%c0_9, %c0_10] : memref<1x32xf32, #tpu.memory_space<vmem>>, vector<1x32xf32>
    %13 = vector.broadcast %12 : vector<1x32xf32> to vector<128x32xf32>
    %14 = arith.addf %11, %13 : vector<128x32xf32>
    %cst_11 = arith.constant 0.000000e+00 : f32
    %15 = vector.broadcast %cst_11 : f32 to vector<128x32xf32>
    %16 = arith.maximumf %14, %15 : vector<128x32xf32>
    %17 = arith.truncf %16 : vector<128x32xf32> to vector<128x32xbf16>
    %c0_12 = arith.constant 0 : index
    %c0_13 = arith.constant 0 : index
    %18 = vector.load %arg6[%c0_12, %c0_13] : memref<32x128xbf16, #tpu.memory_space<vmem>>, vector<32x128xbf16>
    %cst_14 = arith.constant dense<0.000000e+00> : vector<128x128xf32>
    %19 = tpu.matmul %17, %18, %cst_14 {dimension_numbers = #tpu.dot_dimension_numbers<[1], [0], [0], [1], [0, 0, 1, 1], [], []>} : vector<128x32xbf16>, vector<32x128xbf16>, vector<128x128xf32> -> vector<128x128xf32>
    %c0_15 = arith.constant 0 : index
    %c0_16 = arith.constant 0 : index
    %20 = vector.load %arg7[%c0_15, %c0_16] : memref<1x128xf32, #tpu.memory_space<vmem>>, vector<1x128xf32>
    %21 = vector.broadcast %20 : vector<1x128xf32> to vector<128x128xf32>
    %22 = arith.addf %19, %21 : vector<128x128xf32>
    %23 = vector.extract_strided_slice %22 {offsets = [0, 0], sizes = [128, 1], strides = [1, 1]} : vector<128x128xf32> to vector<128x1xf32>
    %24 = arith.negf %23 : vector<128x1xf32>
    %25 = math.exp %24 : vector<128x1xf32>
    %cst_17 = arith.constant 1.000000e+00 : f32
    %26 = vector.broadcast %cst_17 : f32 to vector<128x1xf32>
    %27 = arith.addf %26, %25 : vector<128x1xf32>
    %28 = arith.divf %26, %27 : vector<128x1xf32>
    %c0_18 = arith.constant 0 : index
    %c0_19 = arith.constant 0 : index
    %29 = vector.load %arg8[%c0_18, %c0_19] : memref<128x1xf32, #tpu.memory_space<vmem>>, vector<128x1xf32>
    tpu.vector_store %arg8[%c0_18, %c0_19], %28 {strides = array<i32>} : memref<128x1xf32, #tpu.memory_space<vmem>>, vector<128x1xf32>,
    return
  }
  func.func @transform_0(%arg0: i32) -> (i32, i32) {
    %c0_i32 = arith.constant 0 : i32
    %c0_i32_0 = arith.constant 0 : i32
    return %arg0, %c0_i32 : i32, i32
  }
  func.func @transform_1(%arg0: i32) -> (i32, i32) {
    %c0_i32 = arith.constant 0 : i32
    %c0_i32_0 = arith.constant 0 : i32
    %c0_i32_1 = arith.constant 0 : i32
    return %c0_i32, %c0_i32_0 : i32, i32
  }
  func.func @transform_2(%arg0: i32) -> (i32, i32) {
    %c0_i32 = arith.constant 0 : i32
    %c0_i32_0 = arith.constant 0 : i32
    %c0_i32_1 = arith.constant 0 : i32
    return %c0_i32, %c0_i32_0 : i32, i32
  }
  func.func @transform_3(%arg0: i32) -> (i32, i32) {
    %c0_i32 = arith.constant 0 : i32
    %c0_i32_0 = arith.constant 0 : i32
    %c0_i32_1 = arith.constant 0 : i32
    return %c0_i32, %c0_i32_0 : i32, i32
  }
  func.func @transform_4(%arg0: i32) -> (i32, i32) {
    %c0_i32 = arith.constant 0 : i32
    %c0_i32_0 = arith.constant 0 : i32
    %c0_i32_1 = arith.constant 0 : i32
    return %c0_i32, %c0_i32_0 : i32, i32
  }
  func.func @transform_5(%arg0: i32) -> (i32, i32) {
    %c0_i32 = arith.constant 0 : i32
    %c0_i32_0 = arith.constant 0 : i32
    %c0_i32_1 = arith.constant 0 : i32
    return %c0_i32, %c0_i32_0 : i32, i32
  }
  func.func @transform_6(%arg0: i32) -> (i32, i32) {
    %c0_i32 = arith.constant 0 : i32
    %c0_i32_0 = arith.constant 0 : i32
    %c0_i32_1 = arith.constant 0 : i32
    return %c0_i32, %c0_i32_0 : i32, i32
  }
  func.func @transform_7(%arg0: i32) -> (i32, i32) {
    %c0_i32 = arith.constant 0 : i32
    %c0_i32_0 = arith.constant 0 : i32
    return %arg0, %c0_i32 : i32, i32
  }
}

</mosaic_0001>

<bundles_post_ra>
// kernel: tpu_custom_call.1
= control target key start
LH: loop header
LB: loop body
LE: loop exit
PB: predicated region body
PF: predicated region fallthrough
CT: control target
= control target key end

     0   :  { %s1250_s24 = smov 0   ;;  %s1380_s0 = inlined_call_operand.vmem [shape: f32[256,16], index: 0, kind: input, shape index: {}]   ;;  %s1381_s1 = inlined_call_operand.vmem [shape: bf16[16,64], index: 1, kind: input, shape index: {}]   ;;  %s1382_s2 = inlined_call_operand.vmem [shape: f32[1,64], index: 2, kind: input, shape index: {}]   ;;  %s1383_s3 = inlined_call_operand.vmem [shape: bf16[64,32], index: 3, kind: input, shape index: {}]   ;;  %s1384_s4 = inlined_call_operand.vmem [shape: f32[1,32], index: 4, kind: input, shape index: {}]   ;;  %s1385_s5 = inlined_call_operand.vmem [shape: bf16[32,128], index: 5, kind: input, shape index: {}]   ;;  %s1386_s6 = inlined_call_operand.vmem [shape: f32[1,128], index: 6, kind: input, shape index: {}]   ;;  %s1387_s7 = inlined_call_operand.vmem [shape: f32[256,1], index: 7, kind: output, shape index: {}]  }
   0x1 LB: > { %s967_s25 = sadd.s32 4294967295, %s1208_s24   ;;  %p971_p0 = scmp.ge.s32.totalorder %s1208_s24, 1  ;;  %s1208_s24 = sphi %s1250_s24, %s17_s24  }
   0x2   : > { %p238_p1 = scmp.lt.s32.totalorder %s1208_s24, 3 }
   0x4   : > { %p239_p2 = pnand %p971_p0, %p238_p1 }
   0x5   : > { %s972_s28 = sshll.u32 (!%p239_p2), %s967_s25, 4 }
   0x6   : > { %242 = sbr.rel (%p239_p2) target bundleno = 689 (0x2b1), region = 48  ;;  %p271_p3 = scmp.lt.s32.totalorder (!%p239_p2), %s972_s28, 31 }
   0xb   : > { %v1131_v0 = vld [vmem:[%s1381_s1] sm:$0xff]   ;;  %v1132_v1 = vld [vmem:[%s1383_s3 + $0x18] sm:$0xff]   ;;  %s1389_s28 = smov (!%p271_p3, %s972_s28), 31  ;;  %vm322_vm0 = vcmask 130048   ;;  %v1133_v26 = vld [vmem:[%s1383_s3 + $0x10] sm:$0xff]   ;;  %vm507_vm1 = vcmask 523264  }
   0xc   : > { %1059 = vmatprep.subr.bf16.mxu0 %v1131_v0  ;;  %1121 = vmatprep.subr.bf16.mxu1 %v1131_v0  ;;  %s973_s8 = sshll.u32 %s1389_s28, 3  ;;  %v1134_v27 = vld [vmem:[%s1383_s3 + $0x8] sm:$0xff]   ;;  %v1135_v28 = vld [vmem:[%s1383_s3] sm:$0xff]   ;;  %vm676_vm2 = vcmask 261120   ;;  %vm894_vm3 = vcmask 7168  }
   0xd   : > { %1060 = vmatpush3.bf16.msra.mxu0 %v1131_v0  ;;  %1122 = vmatpush3.bf16.msra.mxu1 %v1131_v0  ;;  %s274_s11 = scalar_lea.vmem %s1380_s0, %s973_s8  ;;  %v1136_v29 = vld [vmem:[%s1385_s5 + $0x8] sm:$0xff]   ;;  %v976_v32 = vld [vmem:[%s1382_s2] ss:$0 sm:$0xff]  ;;  %s1343_s10 = scalar_lea.vmem %s1387_s7, %s973_s8 }
   0xe   : > { %1077 = vmatprep.subr.bf16.mxu1 %v1132_v1  ;;  %v283_v2 = vld [vmem:[%s274_s11] sm:$0xff]  ;;  %v284_v3 = vld [vmem:[%s274_s11 + $0x8] sm:$0xff]  ;;  %v285_v4 = vld [vmem:[%s274_s11 + $0x10] sm:$0xff]  ;;  %1101 = vmatprep.subr.bf16.mxu0 %v1136_v29 }
   0xf   : > { %v299_v5 = vpack.c.bf16 %v284_v3, %v283_v2  ;;  %v286_v6 = vld [vmem:[%s274_s11 + $0x18] sm:$0xff]  ;;  %v287_v7 = vld [vmem:[%s274_s11 + $0x20] sm:$0xff]  ;;  %v288_v8 = vld [vmem:[%s274_s11 + $0x28] sm:$0xff] }
  0x10   : > { %v300_v9 = vpack.c.bf16 %v286_v6, %v285_v4  ;;  %v301_v10 = vpack.c.bf16 %v288_v8, %v287_v7  ;;  %v291_v11 = vld [vmem:[%s274_s11 + $0x40] sm:$0xff]  ;;  %v292_v12 = vld [vmem:[%s274_s11 + $0x48] sm:$0xff]  ;;  %v293_v13 = vld [vmem:[%s274_s11 + $0x50] sm:$0xff] }
  0x11   : > { %1061 = vmatprep.mubr.msk.bf16.mxu0 %vm322_vm0, %v299_v5  ;;  %v294_v14 = vld [vmem:[%s274_s11 + $0x58] sm:$0xff]  ;;  %v303_v15 = vpack.c.bf16 %v292_v12, %v291_v11  ;;  %v295_v17 = vld [vmem:[%s274_s11 + $0x60] sm:$0xff]  ;;  %v296_v18 = vld [vmem:[%s274_s11 + $0x68] sm:$0xff] }
  0x12   : > { %1062 = vmatmul.mubr.msk.bf16.vlgmr.msra.gmra.mxu0 %vm322_vm0, %v300_v9  ;;  %v304_v16 = vpack.c.bf16 %v294_v14, %v293_v13  ;;  %v289_v19 = vld [vmem:[%s274_s11 + $0x30] sm:$0xff]  ;;  %v290_v20 = vld [vmem:[%s274_s11 + $0x38] sm:$0xff]  ;;  %v305_v21 = vpack.c.bf16 %v296_v18, %v295_v17 }
  0x13   : > { %1065 = vmatprep.mubr.msk.bf16.mxu0 %vm322_vm0, %v301_v10  ;;  %1069 = vmatprep.mubr.msk.bf16.mxu1 %vm322_vm0, %v303_v15  ;;  %v302_v22 = vpack.c.bf16 %v290_v20, %v289_v19  ;;  %v297_v23 = vld [vmem:[%s274_s11 + $0x70] sm:$0xff]  ;;  %v298_v24 = vld [vmem:[%s274_s11 + $0x78] sm:$0xff] }
  0x14   : > { %1070 = vmatmul.mubr.msk.bf16.vlgmr.msra.gmra.mxu1 %vm322_vm0, %v304_v16  ;;  %v306_v25 = vpack.c.bf16 %v298_v24, %v297_v23  ;;  %1102 = vmatpush3.bf16.msra.mxu0 %v1136_v29  ;;  %v1137_v23 = vld [vmem:[%s1385_s5] sm:$0xff]  }
  0x15   : > { %1073 = vmatprep.mubr.msk.bf16.mxu1 %vm322_vm0, %v305_v21  ;;  %1078 = vmatpush3.bf16.msra.mxu1 %v1132_v1 }
  0x16   : > { %1079 = vmatprep.subr.bf16.mxu1 %v1133_v26  ;;  %1103 = vmatprep.subr.bf16.mxu0 %v1137_v23 }
  0x18   : > { %1104 = vmatpush3.bf16.msra.mxu0 %v1137_v23 }
  0x19   : > { %1080 = vmatpush3.bf16.msra.mxu1 %v1133_v26  ;;  %v986_v26 = vld [vmem:[%s1384_s4] ss:$0 sm:$0xff] }
  0x1a   : > { %1066 = vmatmul.mubr.msk.bf16.gmra.mxu0 %vm322_vm0, %v302_v22  ;;  %1081 = vmatprep.subr.bf16.mxu1 %v1134_v27 }
  0x1c   : > { %1074 = vmatmul.mubr.msk.bf16.gmra.mxu1 %vm322_vm0, %v306_v25 }
  0x1d   : > { %1082 = vmatpush3.bf16.msra.mxu1 %v1134_v27 }
  0x1e   : > { %1083 = vmatprep.subr.bf16.mxu1 %v1135_v28 }
  0x21   : > { %1084 = vmatpush3.bf16.msra.mxu1 %v1135_v28 }
  0xd2   : > { %v1063_v30 = vpop.f32.mrf.mxu0 }
  0xd3   : > { %v390_v38 = vadd.f32 %v1063_v30, %v976_v32 }
  0xd4   : > { %v381_v31 = vpop.f32.mrf.mxu0  ;;  %v1071_v33 = vpop.f32.mrf.mxu1 }
  0xd5   : > { %v382_v35 = vadd.f32 %v976_v32, %v381_v31  ;;  %v446_v47 = vmax.f32 %v390_v38, 0.0  ;;  %v422_v9 = vadd.f32 %v1071_v33, %v976_v32 }
  0xd6   : > { %v1064_v34 = vpop.f32.mrf.mxu0  ;;  %v413_v37 = vpop.f32.mrf.mxu1 }
  0xd7   : > { %v393_v36 = vadd.f32 %v1064_v34, %v976_v32  ;;  %v444_v44 = vmax.f32 %v382_v35, 0.0  ;;  %v414_v50 = vadd.f32 %v976_v32, %v413_v37  ;;  %v454_v14 = vmax.f32 %v422_v9, 0.0 }
  0xd8   : > { %v384_v39 = vpop.f32.mrf.mxu0  ;;  %v1072_v41 = vpop.f32.mrf.mxu1 }
  0xd9   : > { %v385_v40 = vadd.f32 %v976_v32, %v384_v39  ;;  %v447_v42 = vmax.f32 %v393_v36, 0.0  ;;  %v452_v60 = vmax.f32 %v414_v50, 0.0  ;;  %v425_v11 = vadd.f32 %v1072_v41, %v976_v32 }
  0xda   : > { %v1067_v43 = vpop.f32.mrf.mxu0  ;;  %v416_v46 = vpop.f32.mrf.mxu1 }
  0xdb   : > { %v445_v45 = vmax.f32 %v385_v40, 0.0  ;;  %v417_v51 = vadd.f32 %v976_v32, %v416_v46  ;;  %v461_v53 = vpack.c.bf16 %v447_v42, %v446_v47  ;;  %v406_v58 = vadd.f32 %v1067_v43, %v976_v32 }
  0xdc   : > { %v397_v48 = vpop.f32.mrf.mxu0  ;;  %v1075_v52 = vpop.f32.mrf.mxu1  ;;  %v455_v15 = vmax.f32 %v425_v11, 0.0 }
  0xdd   : > { %v460_v49 = vpack.c.bf16 %v445_v45, %v444_v44  ;;  %v398_v55 = vadd.f32 %v976_v32, %v397_v48  ;;  %v453_v62 = vmax.f32 %v417_v51, 0.0  ;;  %v450_v4 = vmax.f32 %v406_v58, 0.0 }
  0xde   : > { %v1068_v54 = vpop.f32.mrf.mxu0  ;;  %v429_v57 = vpop.f32.mrf.mxu1  ;;  %v465_v17 = vpack.c.bf16 %v455_v15, %v454_v14  ;;  %v438_v18 = vadd.f32 %v1075_v52, %v976_v32 }
  0xdf   : > { %v409_v56 = vadd.f32 %v1068_v54, %v976_v32  ;;  %1085 = vmatprep.mubr.msk.bf16.mxu1 %vm507_vm1, %v460_v49  ;;  %v448_v1 = vmax.f32 %v398_v55, 0.0  ;;  %v464_v6 = vpack.c.bf16 %v453_v62, %v452_v60  ;;  %v430_v7 = vadd.f32 %v976_v32, %v429_v57 }
  0xe0   : > { %v400_v59 = vpop.f32.mrf.mxu0  ;;  %1086 = vmatmul.mubr.msk.bf16.vlgmr.msra.gmra.mxu1 %vm507_vm1, %v461_v53  ;;  %v1076_v63 = vpop.f32.mrf.mxu1  ;;  %v458_v20 = vmax.f32 %v438_v18, 0.0 }
  0xe1   : > { %v401_v61 = vadd.f32 %v976_v32, %v400_v59  ;;  %v451_v0 = vmax.f32 %v409_v56, 0.0  ;;  %v456_v12 = vmax.f32 %v430_v7, 0.0  ;;  %v441_v19 = vadd.f32 %v1076_v63, %v976_v32 }
  0xe2   : > { %v432_v3 = vpop.f32.mrf.mxu1 }
  0xe3   : > { %v449_v2 = vmax.f32 %v401_v61, 0.0  ;;  %v433_v8 = vadd.f32 %v976_v32, %v432_v3  ;;  %v463_v10 = vpack.c.bf16 %v451_v0, %v450_v4  ;;  %v459_v21 = vmax.f32 %v441_v19, 0.0 }
  0xe5   : > { %v462_v5 = vpack.c.bf16 %v449_v2, %v448_v1  ;;  %v457_v13 = vmax.f32 %v433_v8, 0.0  ;;  %v467_v22 = vpack.c.bf16 %v459_v21, %v458_v20 }
  0xe7   : > { %1089 = vmatprep.mubr.msk.bf16.mxu1 %vm507_vm1, %v462_v5  ;;  %v466_v16 = vpack.c.bf16 %v457_v13, %v456_v12 }
  0xe8   : > { %1090 = vmatmul.mubr.msk.bf16.gmra.mxu1 %vm507_vm1, %v463_v10 }
  0xe9   : > { %1093 = vmatprep.mubr.msk.bf16.mxu1 %vm507_vm1, %v464_v6 }
  0xf0   : > { %1094 = vmatmul.mubr.msk.bf16.gmra.mxu1 %vm507_vm1, %v465_v17  ;;  %v1320_v17 = vld [vmem:[%s1386_s6] ss:$0 sm:$0xff] }
  0xf1   : > { %1097 = vmatprep.mubr.msk.bf16.mxu1 %vm507_vm1, %v466_v16 }
  0xf8   : > { %1098 = vmatmul.mubr.msk.bf16.gmra.mxu1 %vm507_vm1, %v467_v22 }
 0x1a0   : > { %v1087_v24 = vpop.f32.mrf.mxu1 }
 0x1a1   : > { %v575_v30 = vadd.f32 %v1087_v24, %v986_v26 }
 0x1a2   : > { %v566_v25 = vpop.f32.mrf.mxu1 }
 0x1a3   : > { %v567_v28 = vadd.f32 %v986_v26, %v566_v25  ;;  %v631_v37 = vmax.f32 %v575_v30, 0.0 }
 0x1a4   : > { %v1088_v27 = vpop.f32.mrf.mxu1 }
 0x1a5   : > { %v578_v29 = vadd.f32 %v1088_v27, %v986_v26  ;;  %v629_v35 = vmax.f32 %v567_v28, 0.0 }
 0x1a6   : > { %v569_v31 = vpop.f32.mrf.mxu1 }
 0x1a7   : > { %v570_v32 = vadd.f32 %v986_v26, %v569_v31  ;;  %v632_v33 = vmax.f32 %v578_v29, 0.0 }
 0x1a8   : > { %v1091_v34 = vpop.f32.mrf.mxu1 }
 0x1a9   : > { %v630_v36 = vmax.f32 %v570_v32, 0.0  ;;  %v646_v40 = vpack.c.bf16 %v632_v33, %v631_v37  ;;  %v591_v44 = vadd.f32 %v1091_v34, %v986_v26 }
 0x1aa   : > { %v582_v38 = vpop.f32.mrf.mxu1 }
 0x1ab   : > { %v645_v39 = vpack.c.bf16 %v630_v36, %v629_v35  ;;  %v583_v42 = vadd.f32 %v986_v26, %v582_v38  ;;  %v635_v51 = vmax.f32 %v591_v44, 0.0 }
 0x1ac   : > { %v1092_v41 = vpop.f32.mrf.mxu1 }
 0x1ad   : > { %v594_v43 = vadd.f32 %v1092_v41, %v986_v26  ;;  %1105 = vmatprep.mubr.msk.bf16.mxu0 %vm676_vm2, %v645_v39  ;;  %v633_v49 = vmax.f32 %v583_v42, 0.0 }
 0x1ae   : > { %v585_v45 = vpop.f32.mrf.mxu1  ;;  %1106 = vmatmul.mubr.msk.bf16.vlgmr.msra.gmra.mxu0 %vm676_vm2, %v646_v40 }
 0x1af   : > { %v586_v46 = vadd.f32 %v986_v26, %v585_v45  ;;  %v636_v47 = vmax.f32 %v594_v43, 0.0 }
 0x1b0   : > { %v1095_v48 = vpop.f32.mrf.mxu1 }
 0x1b1   : > { %v634_v50 = vmax.f32 %v586_v46, 0.0  ;;  %v648_v54 = vpack.c.bf16 %v636_v47, %v635_v51  ;;  %v607_v58 = vadd.f32 %v1095_v48, %v986_v26 }
 0x1b2   : > { %v598_v52 = vpop.f32.mrf.mxu1 }
 0x1b3   : > { %v647_v53 = vpack.c.bf16 %v634_v50, %v633_v49  ;;  %v599_v56 = vadd.f32 %v986_v26, %v598_v52  ;;  %v639_v1 = vmax.f32 %v607_v58, 0.0 }
 0x1b4   : > { %v1096_v55 = vpop.f32.mrf.mxu1 }
 0x1b5   : > { %v610_v57 = vadd.f32 %v1096_v55, %v986_v26  ;;  %1109 = vmatprep.mubr.msk.bf16.mxu0 %vm676_vm2, %v647_v53  ;;  %v637_v63 = vmax.f32 %v599_v56, 0.0 }
 0x1b6   : > { %v601_v59 = vpop.f32.mrf.mxu1  ;;  %1110 = vmatmul.mubr.msk.bf16.gmra.mxu0 %vm676_vm2, %v648_v54 }
 0x1b7   : > { %v602_v60 = vadd.f32 %v986_v26, %v601_v59  ;;  %v640_v61 = vmax.f32 %v610_v57, 0.0 }
 0x1b8   : > { %v1099_v62 = vpop.f32.mrf.mxu1 }
 0x1b9   : > { %v638_v0 = vmax.f32 %v602_v60, 0.0  ;;  %v650_v4 = vpack.c.bf16 %v640_v61, %v639_v1  ;;  %v623_v8 = vadd.f32 %v1099_v62, %v986_v26 }
 0x1ba   : > { %v614_v2 = vpop.f32.mrf.mxu1 }
 0x1bb   : > { %v649_v3 = vpack.c.bf16 %v638_v0, %v637_v63  ;;  %v615_v6 = vadd.f32 %v986_v26, %v614_v2  ;;  %v643_v14 = vmax.f32 %v623_v8, 0.0 }
 0x1bc   : > { %v1100_v5 = vpop.f32.mrf.mxu1 }
 0x1bd   : > { %v626_v7 = vadd.f32 %v1100_v5, %v986_v26  ;;  %1113 = vmatprep.mubr.msk.bf16.mxu0 %vm676_vm2, %v649_v3  ;;  %v641_v12 = vmax.f32 %v615_v6, 0.0 }
 0x1be   : > { %v617_v9 = vpop.f32.mrf.mxu1  ;;  %1114 = vmatmul.mubr.msk.bf16.gmra.mxu0 %vm676_vm2, %v650_v4 }
 0x1bf   : > { %v618_v10 = vadd.f32 %v986_v26, %v617_v9  ;;  %v644_v11 = vmax.f32 %v626_v7, 0.0 }
 0x1c1   : > { %v642_v13 = vmax.f32 %v618_v10, 0.0  ;;  %v652_v16 = vpack.c.bf16 %v644_v11, %v643_v14 }
 0x1c3   : > { %v651_v15 = vpack.c.bf16 %v642_v13, %v641_v12 }
 0x1c5   : > { %1117 = vmatprep.mubr.msk.bf16.mxu0 %vm676_vm2, %v651_v15 }
 0x1c6   : > { %1118 = vmatmul.mubr.msk.bf16.gmra.mxu0 %vm676_vm2, %v652_v16 }
 0x26e   : > { %v1107_v18 = vpop.f32.mrf.mxu0 }
 0x26f   : > { %v744_v19 = vadd.f32 %v1107_v18, %v1320_v17 }
 0x270   : > { %v735_v20 = vpop.f32.mrf.mxu0 }
 0x271   : > { %v1012_v21 = vmul.f32 -1.442695, %v744_v19  ;;  %v736_v22 = vadd.f32 %v1320_v17, %v735_v20 }
 0x272   : > { %v1108_v23 = vpop.f32.mrf.mxu0 }
 0x273   : > { %1138 = vpow2.f32 %v1012_v21  ;;  %v1010_v24 = vmul.f32 -1.442695, %v736_v22  ;;  %v747_v25 = vadd.f32 %v1108_v23, %v1320_v17 }
 0x274   : > { %v738_v26 = vpop.f32.mrf.mxu0 }
 0x275   : > { %1140 = vpow2.f32 %v1010_v24  ;;  %v1013_v27 = vmul.f32 -1.442695, %v747_v25  ;;  %v739_v28 = vadd.f32 %v1320_v17, %v738_v26 }
 0x276   : > { %v1111_v29 = vpop.f32.mrf.mxu0 }
 0x277   : > { %1142 = vpow2.f32 %v1013_v27  ;;  %v1011_v30 = vmul.f32 -1.442695, %v739_v28  ;;  %v760_v31 = vadd.f32 %v1111_v29, %v1320_v17 }
 0x278   : > { %v751_v32 = vpop.f32.mrf.mxu0 }
 0x279   : > { %1144 = vpow2.f32 %v1011_v30  ;;  %v1016_v33 = vmul.f32 -1.442695, %v760_v31  ;;  %v752_v34 = vadd.f32 %v1320_v17, %v751_v32 }
 0x27a   : > { %v1112_v35 = vpop.f32.mrf.mxu0 }
 0x27b   : > { %1146 = vpow2.f32 %v1016_v33  ;;  %v1014_v36 = vmul.f32 -1.442695, %v752_v34  ;;  %v763_v37 = vadd.f32 %v1112_v35, %v1320_v17 }
 0x27c   : > { %v754_v38 = vpop.f32.mrf.mxu0 }
 0x27d   : > { %1148 = vpow2.f32 %v1014_v36  ;;  %v1017_v39 = vmul.f32 -1.442695, %v763_v37  ;;  %v755_v40 = vadd.f32 %v1320_v17, %v754_v38 }
 0x27e   : > { %v1115_v41 = vpop.f32.mrf.mxu0 }
 0x27f   : > { %1150 = vpow2.f32 %v1017_v39  ;;  %v1015_v42 = vmul.f32 -1.442695, %v755_v40  ;;  %v776_v43 = vadd.f32 %v1115_v41, %v1320_v17 }
 0x280   : > { %v1139_v44 = vpop.eup %1138  ;;  %v767_v45 = vpop.f32.mrf.mxu0 }
 0x281   : > { %v848_v46 = vadd.f32 1.0, %v1139_v44  ;;  %1152 = vpow2.f32 %v1015_v42  ;;  %v1020_v47 = vmul.f32 -1.442695, %v776_v43  ;;  %v768_v48 = vadd.f32 %v1320_v17, %v767_v45 }
 0x282   : > { %v1141_v49 = vpop.eup %1140  ;;  %v1116_v50 = vpop.f32.mrf.mxu0 }
 0x283   : > { %1154 = vrcp.f32 %v848_v46  ;;  %v846_v51 = vadd.f32 1.0, %v1141_v49  ;;  %v1018_v52 = vmul.f32 -1.442695, %v768_v48  ;;  %v779_v53 = vadd.f32 %v1116_v50, %v1320_v17 }
 0x284   : > { %v1143_v54 = vpop.eup %1142  ;;  %1156 = vpow2.f32 %v1020_v47  ;;  %v770_v55 = vpop.f32.mrf.mxu0 }
 0x285   : > { %1158 = vrcp.f32 %v846_v51  ;;  %v849_v56 = vadd.f32 1.0, %v1143_v54  ;;  %v1021_v57 = vmul.f32 -1.442695, %v779_v53  ;;  %v771_v58 = vadd.f32 %v1320_v17, %v770_v55 }
 0x286   : > { %v1145_v59 = vpop.eup %1144  ;;  %1160 = vpow2.f32 %v1018_v52  ;;  %v1119_v60 = vpop.f32.mrf.mxu0 }
 0x287   : > { %1162 = vrcp.f32 %v849_v56  ;;  %v847_v61 = vadd.f32 1.0, %v1145_v59  ;;  %v1019_v62 = vmul.f32 -1.442695, %v771_v58  ;;  %v792_v63 = vadd.f32 %v1119_v60, %v1320_v17 }
 0x288   : > { %v1147_v0 = vpop.eup %1146  ;;  %1164 = vpow2.f32 %v1021_v57  ;;  %v783_v1 = vpop.f32.mrf.mxu0 }
 0x289   : > { %1166 = vrcp.f32 %v847_v61  ;;  %v852_v2 = vadd.f32 1.0, %v1147_v0  ;;  %v1024_v3 = vmul.f32 -1.442695, %v792_v63  ;;  %v784_v4 = vadd.f32 %v1320_v17, %v783_v1 }
 0x28a   : > { %v1149_v5 = vpop.eup %1148  ;;  %1168 = vpow2.f32 %v1019_v62  ;;  %v1120_v6 = vpop.f32.mrf.mxu0 }
 0x28b   : > { %1170 = vrcp.f32 %v852_v2  ;;  %v850_v7 = vadd.f32 1.0, %v1149_v5  ;;  %v1022_v8 = vmul.f32 -1.442695, %v784_v4  ;;  %v795_v9 = vadd.f32 %v1120_v6, %v1320_v17 }
 0x28c   : > { %v1151_v10 = vpop.eup %1150  ;;  %1172 = vpow2.f32 %v1024_v3  ;;  %v786_v11 = vpop.f32.mrf.mxu0 }
 0x28d   : > { %1174 = vrcp.f32 %v850_v7  ;;  %v853_v12 = vadd.f32 1.0, %v1151_v10  ;;  %v1025_v13 = vmul.f32 -1.442695, %v795_v9  ;;  %v787_v14 = vadd.f32 %v1320_v17, %v786_v11 }
 0x28e   : > { %v1153_v15 = vpop.eup %1152  ;;  %1176 = vpow2.f32 %v1022_v8 }
 0x28f   : > { %1178 = vrcp.f32 %v853_v12  ;;  %v851_v16 = vadd.f32 1.0, %v1153_v15  ;;  %v1023_v18 = vmul.f32 -1.442695, %v787_v14 }
 0x290   : > { %v1155_v19 = vpop.eup %1154  ;;  %1180 = vpow2.f32 %v1025_v13 }
 0x291   : > { %v1157_v20 = vpop.eup %1156  ;;  %897 = vst.msk [vmem:[%s1343_s10 + $0x10] sm:$0xff] %vm894_vm3, %v1155_v19  ;;  %1182 = vrcp.f32 %v851_v16 }
 0x292   : > { %v1159_v17 = vpop.eup %1158  ;;  %v856_v21 = vadd.f32 1.0, %v1157_v20  ;;  %1184 = vpow2.f32 %v1023_v18 }
 0x293   : > { %v1161_v22 = vpop.eup %1160  ;;  %895 = vst.msk [vmem:[%s1343_s10] sm:$0xff] %vm894_vm3, %v1159_v17 }
 0x294   : > { %v1163_v23 = vpop.eup %1162  ;;  %1186 = vrcp.f32 %v856_v21  ;;  %v854_v24 = vadd.f32 1.0, %v1161_v22 }
 0x295   : > { %v1165_v25 = vpop.eup %1164  ;;  %898 = vst.msk [vmem:[%s1343_s10 + $0x18] sm:$0xff] %vm894_vm3, %v1163_v23 }
 0x296   : > { %v1167_v26 = vpop.eup %1166  ;;  %1188 = vrcp.f32 %v854_v24  ;;  %v857_v27 = vadd.f32 1.0, %v1165_v25 }
 0x297   : > { %v1169_v28 = vpop.eup %1168  ;;  %896 = vst.msk [vmem:[%s1343_s10 + $0x8] sm:$0xff] %vm894_vm3, %v1167_v26 }
 0x298   : > { %v1171_v29 = vpop.eup %1170  ;;  %1190 = vrcp.f32 %v857_v27  ;;  %v855_v30 = vadd.f32 1.0, %v1169_v28 }
 0x299   : > { %v1173_v31 = vpop.eup %1172  ;;  %901 = vst.msk [vmem:[%s1343_s10 + $0x30] sm:$0xff] %vm894_vm3, %v1171_v29 }
 0x29a   : > { %v1175_v32 = vpop.eup %1174  ;;  %1192 = vrcp.f32 %v855_v30  ;;  %v860_v33 = vadd.f32 1.0, %v1173_v31 }
 0x29b   : > { %v1177_v34 = vpop.eup %1176  ;;  %899 = vst.msk [vmem:[%s1343_s10 + $0x20] sm:$0xff] %vm894_vm3, %v1175_v32 }
 0x29c   : > { %v1179_v35 = vpop.eup %1178  ;;  %1194 = vrcp.f32 %v860_v33  ;;  %v858_v36 = vadd.f32 1.0, %v1177_v34 }
 0x29d   : > { %v1181_v37 = vpop.eup %1180  ;;  %902 = vst.msk [vmem:[%s1343_s10 + $0x38] sm:$0xff] %vm894_vm3, %v1179_v35 }
 0x29e   : > { %v1183_v38 = vpop.eup %1182  ;;  %1196 = vrcp.f32 %v858_v36  ;;  %v861_v39 = vadd.f32 1.0, %v1181_v37 }
 0x29f   : > { %v1185_v40 = vpop.eup %1184  ;;  %900 = vst.msk [vmem:[%s1343_s10 + $0x28] sm:$0xff] %vm894_vm3, %v1183_v38 }
 0x2a0   : > { %1198 = vrcp.f32 %v861_v39  ;;  %v859_v41 = vadd.f32 1.0, %v1185_v40 }
 0x2a1   : > { %v1187_v42 = vpop.eup %1186 }
 0x2a2   : > { %905 = vst.msk [vmem:[%s1343_s10 + $0x50] sm:$0xff] %vm894_vm3, %v1187_v42  ;;  %1200 = vrcp.f32 %v859_v41 }
 0x2a3   : > { %v1189_v43 = vpop.eup %1188 }
 0x2a4   : > { %903 = vst.msk [vmem:[%s1343_s10 + $0x40] sm:$0xff] %vm894_vm3, %v1189_v43 }
 0x2a5   : > { %v1191_v44 = vpop.eup %1190 }
 0x2a6   : > { %906 = vst.msk [vmem:[%s1343_s10 + $0x58] sm:$0xff] %vm894_vm3, %v1191_v44 }
 0x2a7   : > { %v1193_v45 = vpop.eup %1192 }
 0x2a8   : > { %904 = vst.msk [vmem:[%s1343_s10 + $0x48] sm:$0xff] %vm894_vm3, %v1193_v45 }
 0x2a9   : > { %v1195_v46 = vpop.eup %1194 }
 0x2aa   : > { %909 = vst.msk [vmem:[%s1343_s10 + $0x70] sm:$0xff] %vm894_vm3, %v1195_v46 }
 0x2ab   : > { %v1197_v47 = vpop.eup %1196 }
 0x2ac   : > { %907 = vst.msk [vmem:[%s1343_s10 + $0x60] sm:$0xff] %vm894_vm3, %v1197_v47 }
 0x2ad   : > { %v1199_v48 = vpop.eup %1198 }
 0x2ae   : > { %910 = vst.msk [vmem:[%s1343_s10 + $0x78] sm:$0xff] %vm894_vm3, %v1199_v48 }
 0x2af   : > { %v1201_v49 = vpop.eup %1200 }
 0x2b0   : > { %908 = vst.msk [vmem:[%s1343_s10 + $0x68] sm:$0xff] %vm894_vm3, %v1201_v49 }
 0x2b1 PF: > { %s17_s24 = sadd.s32 1, %s1208_s24  }
 0x2b2   : > { %p14_p4 = scmp.ge.s32.totalorder %s17_s24, 4  }
 0x2b4   :  { %16 = sbr.rel (!%p14_p4) target bundleno = 1 (0x1), region = 78 }

</bundles_post_ra>
